<compile_context>
chip_gen: v6e
topology: v6e:2x2x1
jax: 0.10.0
libtpu: 0.0.40
codegen_flags: <defaults>
</compile_context>

<pallas_src>
import jax
import jax.numpy as jnp
from jax.experimental import pallas as pl
from jax.experimental.pallas import tpu as pltpu


def _flatnce_kernel(sim_ref, diag_ref, clogits_ref, m_sc, l_sc):
    tm, tn = sim_ref.shape
    j = pl.program_id(1)
    nj = pl.num_programs(1)

    @pl.when(j == 0)
    def _():
        m_sc[...] = jnp.full_like(m_sc, -jnp.inf)
        l_sc[...] = jnp.zeros_like(l_sc)

    # Upcast the native-dtype tile to f32 inside VMEM (v5e VPU has no bf16).
    sim = sim_ref[...].astype(jnp.float32)                            # (TM, TN)

    row_start = pl.program_id(0) * tm
    col_start = j * tn
    local_row = jax.lax.broadcasted_iota(jnp.int32, (tm, 1), 0)       # (TM, 1)
    col_ids = jax.lax.broadcasted_iota(jnp.int32, (tm, tn), 1)        # (TM, TN)
    diag_mask = (col_ids + col_start) == (local_row + row_start)      # (TM, TN)

    # Online (streaming) logsumexp over the diagonal-masked negatives.
    neg = jnp.where(diag_mask, -jnp.inf, sim)                         # (TM, TN)
    m_prev = m_sc[...]
    m_new = jnp.maximum(m_prev, jnp.max(neg, axis=1, keepdims=True))  # (TM, 1)
    alpha = jnp.exp(m_prev - m_new)                                   # 0 at j==0
    l_sc[...] = alpha * l_sc[...] + jnp.sum(jnp.exp(neg - m_new),
                                            axis=1, keepdims=True)
    m_sc[...] = m_new

    @pl.when(j == nj - 1)
    def _():
        # Positive similarity per row from the small diagonal block (TM-wide
        # reduce instead of a full B-wide reduce); subtract pos once at end.
        sq = diag_ref[...].astype(jnp.float32)                        # (TM, TM)
        sq_cols = jax.lax.broadcasted_iota(jnp.int32, (tm, tm), 1)
        pos = jnp.sum(jnp.where(sq_cols == local_row, sq, 0.0),
                      axis=1, keepdims=True)                          # (TM, 1)
        clogits_ref[...] = m_sc[...] + jnp.log(l_sc[...]) - pos


_TM_CANDIDATES = (512, 256, 128)
_TN_CANDIDATES = (8192, 4096, 2048, 1024, 512, 256, 128)
_VMEM_BUDGET = 20 * 1024 * 1024   # conservative vs the 32 MiB we request


def _fits(tm, tn, itemsize):
    # double-buffered native stripe + double-buffered diag block + f32 temps.
    return (2 * tm * tn * itemsize
            + 2 * tm * tm * itemsize
            + 3 * tm * tn * 4) <= _VMEM_BUDGET


def _pick_tiles(batch, itemsize):
    tm = next((c for c in _TM_CANDIDATES if batch % c == 0), batch)
    if _fits(tm, batch, itemsize):
        return tm, batch                      # single column block (no streaming)
    tn = next((c for c in _TN_CANDIDATES
               if batch % c == 0 and _fits(tm, c, itemsize)), None)
    if tn is None:
        tn = 128 if batch % 128 == 0 else batch
    return tm, tn


def flat_nce(similarity, *, tile_rows=None, tile_cols=None):
    """similarity: (B, B), any float dtype. Returns (loss_scalar, clogits (B,))."""
    B = similarity.shape[0]
    assert similarity.shape == (B, B), "similarity must be square (B, B)"

    itemsize = jnp.dtype(similarity.dtype).itemsize
    auto_tm, auto_tn = _pick_tiles(B, itemsize)
    tm = tile_rows if tile_rows is not None else auto_tm
    tn = tile_cols if tile_cols is not None else auto_tn

    if tm != B and (B % tm != 0 or tm % 128 != 0):
        raise ValueError(f"tile_rows={tm} must divide B={B} and be a multiple "
                         f"of 128 (or equal B).")
    if tn != B and (B % tn != 0 or tn % 128 != 0):
        raise ValueError(f"tile_cols={tn} must divide B={B} and be a multiple "
                         f"of 128 (or equal B).")

    grid = (B // tm, B // tn)

    clogits = pl.pallas_call(
        _flatnce_kernel,
        out_shape=jax.ShapeDtypeStruct((B, 1), jnp.float32),
        grid=grid,
        in_specs=[
            pl.BlockSpec((tm, tn), lambda i, j: (i, j)),   # row/col tile
            pl.BlockSpec((tm, tm), lambda i, j: (i, i)),   # diagonal block (pos),
                                                           # constant over j
        ],
        out_specs=pl.BlockSpec((tm, 1), lambda i, j: (i, 0)),
        scratch_shapes=[
            pltpu.VMEM((tm, 1), jnp.float32),   # running max  m
            pltpu.VMEM((tm, 1), jnp.float32),   # running sum  l
        ],
        compiler_params=pltpu.CompilerParams(
            dimension_semantics=("parallel", "arbitrary"),
            vmem_limit_bytes=32 * 1024 * 1024,
        ),
    )(similarity, similarity)

    clogits = clogits[:, 0]
    # Forward loss is identically 1.0 by construction; kept as the literal
    # formula (cheap, B elements) for semantic fidelity.
    loss = jnp.mean(jnp.exp(clogits - jax.lax.stop_gradient(clogits)))
    return loss, clogits


def _reference_clogits(sim_f32):
    Bn = sim_f32.shape[0]
    d = jnp.eye(Bn, dtype=bool)
    pos = jnp.sum(jnp.where(d, sim_f32, 0.0), axis=1, keepdims=True)
    neg = jnp.where(d, -jnp.inf, sim_f32 - pos)
    return jax.scipy.special.logsumexp(neg, axis=1)


if __name__ == "__main__":
    key = jax.random.PRNGKey(0)

    # --- small single-block case (B=16) ------------------------------------
    B, D = 16, 32
    feats = jax.random.normal(key, (B, D), dtype=jnp.float32)
    feats = feats / jnp.linalg.norm(feats, axis=-1, keepdims=True)
    sim = feats @ feats.T                                  # (B, B) cosine sims

    loss, clogits = flat_nce(sim)
    jax.block_until_ready((loss, clogits))
    ref = _reference_clogits(sim)
    assert jnp.allclose(clogits, ref, atol=1e-5), "clogits mismatch (small)"
    assert jnp.allclose(loss, 1.0, atol=1e-6), "loss mismatch (small)"

    # --- multi-tile case exercising the 2-D grid / online logsumexp --------
    B2, D2 = 256, 32
    feats2 = jax.random.normal(jax.random.PRNGKey(0), (B2, D2), dtype=jnp.float32)
    feats2 = feats2 / jnp.linalg.norm(feats2, axis=-1, keepdims=True)
    sim2 = feats2 @ feats2.T

    loss2, clogits2 = flat_nce(sim2, tile_rows=128, tile_cols=128)   # grid (2, 2)
    jax.block_until_ready((loss2, clogits2))
    ref2 = _reference_clogits(sim2)
    assert jnp.allclose(clogits2, ref2, atol=1e-5), "clogits mismatch (multi-tile)"
    assert jnp.allclose(loss2, 1.0, atol=1e-6), "loss mismatch (multi-tile)"

    # --- default (auto-picked) tiling, f32 ----------------------------------
    loss2b, clogits2b = flat_nce(sim2)
    jax.block_until_ready((loss2b, clogits2b))
    assert jnp.allclose(clogits2b, ref2, atol=1e-5), "clogits mismatch (auto-tile)"

    # --- bf16 native-dtype input (upcast happens inside the kernel) --------
    sim2_bf16 = sim2.astype(jnp.bfloat16)
    loss3, clogits3 = flat_nce(sim2_bf16, tile_rows=128, tile_cols=128)
    jax.block_until_ready((loss3, clogits3))
    ref3 = _reference_clogits(sim2_bf16.astype(jnp.float32))
    assert jnp.allclose(clogits3, ref3, atol=1e-3, rtol=1e-3), "clogits mismatch (bf16)"

    print("KERNEL_OK")
</pallas_src>

<mosaic_0001>
module attributes {stable_mosaic.version = 11 : i64} {
  func.func @_flatnce_kernel(%arg0: i32, %arg1: i32, %arg2: memref<16x16xf32, #tpu.memory_space<vmem>>, %arg3: memref<16x16xf32, #tpu.memory_space<vmem>>, %arg4: memref<16x1xf32, #tpu.memory_space<vmem>>, %arg5: memref<16x1xf32, #tpu.memory_space<vmem>>, %arg6: memref<16x1xf32, #tpu.memory_space<vmem>>) attributes {dimension_semantics = [#tpu.dimension_semantics<parallel>, #tpu.dimension_semantics<arbitrary>], iteration_bounds = array<i64: 1, 1>, scalar_prefetch = 0 : i64, scratch_operands = 2 : i64, tpu.core_type = #tpu.core_type<tc>, window_params = [{transform_indices = @transform_0, window_bounds = array<i64: 16, 16>}, {transform_indices = @transform_1, window_bounds = array<i64: 16, 16>}, {transform_indices = @transform_2, window_bounds = array<i64: 16, 1>}]} {
    %c0_i32 = arith.constant 0 : i32
    %0 = arith.cmpi eq, %arg1, %c0_i32 : i32
    %1 = arith.extui %0 : i1 to i32
    %c0_i32_0 = arith.constant 0 : i32
    %2 = arith.cmpi ne, %1, %c0_i32_0 : i32
    scf.if %2 {
      %cst_15 = arith.constant 0xFF800000 : f32
      %35 = vector.broadcast %cst_15 : f32 to vector<16x1xf32>
      %c0_16 = arith.constant 0 : index
      %c0_17 = arith.constant 0 : index
      %36 = vector.load %arg5[%c0_16, %c0_17] : memref<16x1xf32, #tpu.memory_space<vmem>>, vector<16x1xf32>
      tpu.vector_store %arg5[%c0_16, %c0_17], %35 {strides = array<i32>} : memref<16x1xf32, #tpu.memory_space<vmem>>, vector<16x1xf32>,
      %cst_18 = arith.constant 0.000000e+00 : f32
      %37 = vector.broadcast %cst_18 : f32 to vector<16x1xf32>
      %c0_19 = arith.constant 0 : index
      %c0_20 = arith.constant 0 : index
      %38 = vector.load %arg6[%c0_19, %c0_20] : memref<16x1xf32, #tpu.memory_space<vmem>>, vector<16x1xf32>
      tpu.vector_store %arg6[%c0_19, %c0_20], %37 {strides = array<i32>} : memref<16x1xf32, #tpu.memory_space<vmem>>, vector<16x1xf32>,
    } else {
    }
    %c0 = arith.constant 0 : index
    %c0_1 = arith.constant 0 : index
    %3 = vector.load %arg2[%c0, %c0_1] : memref<16x16xf32, #tpu.memory_space<vmem>>, vector<16x16xf32>
    %c16_i32 = arith.constant 16 : i32
    %4 = arith.muli %arg0, %c16_i32 : i32
    %c16_i32_2 = arith.constant 16 : i32
    %5 = arith.muli %arg1, %c16_i32_2 : i32
    %6 = tpu.iota {dimensions = array<i32: 0>} : vector<16x1xi32>
    %7 = tpu.iota {dimensions = array<i32: 1>} : vector<16x16xi32>
    %8 = vector.broadcast %5 : i32 to vector<16x16xi32>
    %9 = arith.addi %7, %8 : vector<16x16xi32>
    %10 = vector.broadcast %4 : i32 to vector<16x1xi32>
    %11 = arith.addi %6, %10 : vector<16x1xi32>
    %12 = vector.broadcast %11 : vector<16x1xi32> to vector<16x16xi32>
    %13 = arith.cmpi eq, %9, %12 : vector<16x16xi32>
    %cst = arith.constant 0xFF800000 : f32
    %14 = vector.broadcast %cst : f32 to vector<16x16xf32>
    %15 = arith.select %13, %14, %3 : vector<16x16xi1>, vector<16x16xf32>
    %c0_3 = arith.constant 0 : index
    %c0_4 = arith.constant 0 : index
    %16 = vector.load %arg5[%c0_3, %c0_4] : memref<16x1xf32, #tpu.memory_space<vmem>>, vector<16x1xf32>
    %cst_5 = arith.constant dense<0xFF800000> : vector<16xf32>
    %17 = vector.multi_reduction <maximumf>, %15, %cst_5 [1] : vector<16x16xf32> to vector<16xf32>
    %18 = vector.shape_cast %17 : vector<16xf32> to vector<16x1xf32>
    %19 = arith.maximumf %16, %18 : vector<16x1xf32>
    %20 = arith.subf %16, %19 : vector<16x1xf32>
    %21 = math.exp %20 : vector<16x1xf32>
    %c0_6 = arith.constant 0 : index
    %c0_7 = arith.constant 0 : index
    %22 = vector.load %arg6[%c0_6, %c0_7] : memref<16x1xf32, #tpu.memory_space<vmem>>, vector<16x1xf32>
    %23 = arith.mulf %21, %22 : vector<16x1xf32>
    %24 = vector.broadcast %19 : vector<16x1xf32> to vector<16x16xf32>
    %25 = arith.subf %15, %24 : vector<16x16xf32>
    %26 = math.exp %25 : vector<16x16xf32>
    %cst_8 = arith.constant dense<0.000000e+00> : vector<16xf32>
    %27 = vector.multi_reduction <add>, %26, %cst_8 [1] : vector<16x16xf32> to vector<16xf32>
    %28 = vector.shape_cast %27 : vector<16xf32> to vector<16x1xf32>
    %29 = arith.addf %23, %28 : vector<16x1xf32>
    %c0_9 = arith.constant 0 : index
    %c0_10 = arith.constant 0 : index
    %30 = vector.load %arg6[%c0_9, %c0_10] : memref<16x1xf32, #tpu.memory_space<vmem>>, vector<16x1xf32>
    tpu.vector_store %arg6[%c0_9, %c0_10], %29 {strides = array<i32>} : memref<16x1xf32, #tpu.memory_space<vmem>>, vector<16x1xf32>,
    %c0_11 = arith.constant 0 : index
    %c0_12 = arith.constant 0 : index
    %31 = vector.load %arg5[%c0_11, %c0_12] : memref<16x1xf32, #tpu.memory_space<vmem>>, vector<16x1xf32>
    tpu.vector_store %arg5[%c0_11, %c0_12], %19 {strides = array<i32>} : memref<16x1xf32, #tpu.memory_space<vmem>>, vector<16x1xf32>,
    %c0_i32_13 = arith.constant 0 : i32
    %32 = arith.cmpi eq, %arg1, %c0_i32_13 : i32
    %33 = arith.extui %32 : i1 to i32
    %c0_i32_14 = arith.constant 0 : i32
    %34 = arith.cmpi ne, %33, %c0_i32_14 : i32
    scf.if %34 {
      %c0_15 = arith.constant 0 : index
      %c0_16 = arith.constant 0 : index
      %35 = vector.load %arg3[%c0_15, %c0_16] : memref<16x16xf32, #tpu.memory_space<vmem>>, vector<16x16xf32>
      %36 = tpu.iota {dimensions = array<i32: 1>} : vector<16x16xi32>
      %37 = vector.broadcast %6 : vector<16x1xi32> to vector<16x16xi32>
      %38 = arith.cmpi eq, %36, %37 : vector<16x16xi32>
      %cst_17 = arith.constant 0.000000e+00 : f32
      %39 = vector.broadcast %cst_17 : f32 to vector<16x16xf32>
      %40 = arith.select %38, %35, %39 : vector<16x16xi1>, vector<16x16xf32>
      %cst_18 = arith.constant dense<0.000000e+00> : vector<16xf32>
      %41 = vector.multi_reduction <add>, %40, %cst_18 [1] : vector<16x16xf32> to vector<16xf32>
      %42 = vector.shape_cast %41 : vector<16xf32> to vector<16x1xf32>
      %c0_19 = arith.constant 0 : index
      %c0_20 = arith.constant 0 : index
      %43 = vector.load %arg5[%c0_19, %c0_20] : memref<16x1xf32, #tpu.memory_space<vmem>>, vector<16x1xf32>
      %c0_21 = arith.constant 0 : index
      %c0_22 = arith.constant 0 : index
      %44 = vector.load %arg6[%c0_21, %c0_22] : memref<16x1xf32, #tpu.memory_space<vmem>>, vector<16x1xf32>
      %45 = math.log %44 : vector<16x1xf32>
      %46 = arith.addf %43, %45 : vector<16x1xf32>
      %47 = arith.subf %46, %42 : vector<16x1xf32>
      %c0_23 = arith.constant 0 : index
      %c0_24 = arith.constant 0 : index
      %48 = vector.load %arg4[%c0_23, %c0_24] : memref<16x1xf32, #tpu.memory_space<vmem>>, vector<16x1xf32>
      tpu.vector_store %arg4[%c0_23, %c0_24], %47 {strides = array<i32>} : memref<16x1xf32, #tpu.memory_space<vmem>>, vector<16x1xf32>,
    } else {
    }
    return
  }
  func.func @transform_0(%arg0: i32, %arg1: i32) -> (i32, i32) {
    %c0_i32 = arith.constant 0 : i32
    return %arg0, %arg1 : i32, i32
  }
  func.func @transform_1(%arg0: i32, %arg1: i32) -> (i32, i32) {
    %c0_i32 = arith.constant 0 : i32
    return %arg0, %arg0 : i32, i32
  }
  func.func @transform_2(%arg0: i32, %arg1: i32) -> (i32, i32) {
    %c0_i32 = arith.constant 0 : i32
    %c0_i32_0 = arith.constant 0 : i32
    return %arg0, %c0_i32 : i32, i32
  }
}

</mosaic_0001>

<bundles_post_ra>
// kernel: tpu_custom_call.1
= control target key start
LH: loop header
LB: loop body
LE: loop exit
PB: predicated region body
PF: predicated region fallthrough
CT: control target
= control target key end

     0   :  { %7 = vsyncpa [#allocation5], 0  ;;  %s270_s0 = inlined_call_operand.hbm [shape: f32[16,16], index: 0, kind: input, shape index: {}]   ;;  %s271_s1 = inlined_call_operand.hbm [shape: f32[16,16], index: 1, kind: input, shape index: {}]   ;;  %s272_s2 = inlined_call_operand.vmem [shape: f32[16,1], index: 2, kind: output, shape index: {}]  }
   0x1   :  { %8 = vsyncpa [#allocation7], 0  ;;  %s216_s9 = smov [#allocation4]  }
   0x2   :  { %s14_s10 = sshll.u32 %s216_s9, 4  ;;  %s15_s10 = int_to_ptr.vmem [resolvable:$true] %s14_s10 }
   0x3   :  { %s180_s11 = scalar_lea.vmem %s15_s10, 256  ;;  %p185_p1 = scmp.lt.s32.totalorder %s15_s10, %s15_s10 }
   0x4   :  { %p181_p0 = scmp.ne.s32.totalorder %s15_s10, %s180_s11  ;;  %p186_p2 = scmp.lt.s32.totalorder %s180_s11, %s180_s11 }
   0x6   :  { %p187_p3 = por %p186_p2, %p185_p1 }
   0x8   :  { %p188_p4 = pnand %p187_p3, %p181_p0 }
   0xa   :  { %191 = shalt.err (!%p188_p4)
}
   0xb   :  { %s217_s12 = smov 128   ;;  %s218_s13 = smov 8  }
   0xc   :  { %20 = dma.hbm_to_vmem [thread:$0]  %s270_s0, 256, %s15_s10, [#allocation5], %s217_s12, %s217_s12, %s218_s13  }
   0xd   :  { %s219_s16 = smov [#allocation6]  }
   0xe   :  { %s26_s17 = sshll.u32 %s219_s16, 4  ;;  %s27_s17 = int_to_ptr.vmem [resolvable:$true] %s26_s17 }
   0xf   :  { %s200_s18 = scalar_lea.vmem %s27_s17, 256  ;;  %p205_p6 = scmp.lt.s32.totalorder %s27_s17, %s27_s17 }
  0x10   :  { %p201_p5 = scmp.ne.s32.totalorder %s27_s17, %s200_s18  ;;  %p206_p7 = scmp.lt.s32.totalorder %s200_s18, %s200_s18 }
  0x12   :  { %p207_p8 = por %p206_p7, %p205_p6 }
  0x14   :  { %p208_p9 = pnand %p207_p8, %p201_p5 }
  0x16   :  { %211 = shalt.err (!%p208_p9)
}
  0x17   :  { %32 = dma.hbm_to_vmem [thread:$0]  %s271_s1, 256, %s27_s17, [#allocation7], %s217_s12, %s217_s12, %s218_s13  }
  0x18   :  { %212 = dma.done.wait [#allocation5], 256  }
  0x19   :  { %213 = vsyncadd [#allocation5], 4294967040 }
  0x1a   :  { %214 = dma.done.wait [#allocation7], 256  }
  0x1b   :  { %215 = vsyncadd [#allocation7], 4294967040  ;;  %v52_v0 = vlaneseq  ;;  %vm43_vm0 = vcmask 7168   ;;  %v220_v1 = vmov -inf   ;;  %vm68_vm2 = vcmask 130048   ;;  %v48_v5 = vld [vmem:[#allocation4] sm:$0xff] }
  0x1c   :  { %44 = vst.msk [vmem:[#allocation2] sm:$0xff] %vm43_vm0, %v220_v1  ;;  %45 = vst.msk [vmem:[#allocation2 + $0x8] sm:$0xff] %vm43_vm0, %v220_v1  ;;  %v49_v6 = vld [vmem:[#allocation4 + $0x8] sm:$0xff]  ;;  %v221_v11 = vmov 0   ;;  %v222_v12 = vmov 0.0   ;;  %v119_v27 = vld [vmem:[#allocation6] sm:$0xff] }
  0x1d   :  { %v53_v2 = vshrl.u32 %v52_v0, 7  ;;  %v56_v3 = vand.u32 127, %v52_v0  ;;  %158 = vset.pattern.permute.xlu1 %v221_v11  ;;  %159 = vset.pattern.permute.xlu0 %v221_v11  ;;  %46 = vst.msk [vmem:[#allocation3] sm:$0xff] %vm43_vm0, %v222_v12  ;;  %47 = vst.msk [vmem:[#allocation3 + $0x8] sm:$0xff] %vm43_vm0, %v222_v12  ;;  %v120_v31 = vld [vmem:[#allocation6 + $0x8] sm:$0xff] }
  0x1f   :  { %v54_v4 = vadd.s32 8, %v53_v2  ;;  %vm62_vm1 = vcmp.eq.s32.totalorder %v56_v3, %v53_v2 }
  0x20   :  { %v64_v7 = vsel %vm62_vm1, -inf, %v48_v5  ;;  %v123_v29 = vsel %vm62_vm1, %v119_v27, 0.0 }
  0x21   :  { %vm63_vm3 = vcmp.eq.s32.totalorder %v56_v3, %v54_v4  ;;  %v69_v9 = vsel %vm68_vm2, %v64_v7, -inf  ;;  %v125_v32 = vsel %vm68_vm2, %v123_v29, 0.0 }
  0x22   :  { %v65_v8 = vsel %vm63_vm3, -inf, %v49_v6  ;;  %70 = vmax.xlane.f32.xlu0 %v69_v9  ;;  %v124_v34 = vsel %vm63_vm3, %v120_v31, 0.0 }
  0x23   :  { %v72_v10 = vsel %vm68_vm2, %v65_v8, -inf  ;;  %v66_v13 = vld [vmem:[#allocation2] sm:$0xff]  ;;  %v67_v16 = vld [vmem:[#allocation2 + $0x8] sm:$0xff]  ;;  %v128_v36 = vsel %vm68_vm2, %v124_v34, 0.0 }
  0x24   :  { %v83_v40 = vld [vmem:[#allocation3] sm:$0xff]  ;;  %v84_v44 = vld [vmem:[#allocation3 + $0x8] sm:$0xff] }
  0x26   :  { %73 = vmax.xlane.f32.xlu0 %v72_v10 }
  0xab   :  { %v71_v14 = vpop.xlane.xlu0 %70 }
  0xac   :  { %v75_v15 = vmax.f32 %v66_v13, %v71_v14 }
  0xae   :  { %v77_v17 = vsub.f32 %v66_v13, %v75_v15  ;;  %114 = vst.msk [vmem:[#allocation2] sm:$0xff] %vm43_vm0, %v75_v15  ;;  %89 = vperm.xlu1 %158, %v75_v15  }
  0xaf   :  { %v74_v18 = vpop.xlane.xlu0 %73 }
  0xb0   :  { %v76_v19 = vmax.f32 %v67_v16, %v74_v18  ;;  %v79_v37 = vmul.f32 1.442695, %v77_v17 }
  0xb2   :  { %v78_v20 = vsub.f32 %v67_v16, %v76_v19  ;;  %115 = vst.msk [vmem:[#allocation2 + $0x8] sm:$0xff] %vm43_vm0, %v76_v19  ;;  %94 = vperm.xlu1 %158, %v76_v19  }
  0xb4   :  { %v81_v38 = vmul.f32 1.442695, %v78_v20 }
  0xb5   :  { %v131_v54 = vld [vmem:[#allocation2] sm:$0xff] }
  0xb9   :  { %v132_v59 = vld [vmem:[#allocation2 + $0x8] sm:$0xff] }
 0x129   :  { %v90_v21 = vpop.permute.xlu1 %89 }
 0x12a   :  { %v97_v22 = vsub.f32 %v64_v7, %v90_v21 }
 0x12c   :  { %v99_v23 = vmul.f32 1.442695, %v97_v22 }
 0x12d   :  { %v95_v24 = vpop.permute.xlu1 %94 }
 0x12e   :  { %160 = vpow2.f32 %v99_v23  ;;  %v98_v25 = vsub.f32 %v65_v8, %v95_v24 }
 0x130   :  { %v101_v26 = vmul.f32 1.442695, %v98_v25 }
 0x132   :  { %162 = vpow2.f32 %v101_v26 }
 0x133   :  { %164 = vpow2.f32 %v79_v37 }
 0x134   :  { %166 = vpow2.f32 %v81_v38 }
 0x13b   :  { %v161_v28 = vpop.eup %160 }
 0x13c   :  { %v103_v30 = vsel %vm68_vm2, %v161_v28, 0.0 }
 0x13d   :  { %104 = vadd.xlane.f32.xlu0 %v103_v30 }
 0x13f   :  { %v163_v33 = vpop.eup %162 }
 0x140   :  { %v106_v35 = vsel %vm68_vm2, %v163_v33, 0.0  ;;  %v165_v39 = vpop.eup %164 }
 0x141   :  { %107 = vadd.xlane.f32.xlu1 %v106_v35  ;;  %126 = vadd.xlane.f32.xlu0 %v125_v32  ;;  %v85_v41 = vmul.f32 %v165_v39, %v83_v40  ;;  %v167_v42 = vpop.eup %166 }
 0x142   :  { %v86_v46 = vmul.f32 %v167_v42, %v84_v44 }
 0x145   :  { %129 = vadd.xlane.f32.xlu0 %v128_v36 }
 0x1c6   :  { %v105_v43 = vpop.xlane.xlu0 %104 }
 0x1c7   :  { %v109_v45 = vadd.f32 %v105_v43, %v85_v41 }
 0x1c9   :  { %112 = vst.msk [vmem:[#allocation3] sm:$0xff] %vm43_vm0, %v109_v45 }
 0x1ca   :  { %v108_v47 = vpop.xlane.xlu1 %107  ;;  %v127_v52 = vpop.xlane.xlu0 %126 }
 0x1cb   :  { %v110_v48 = vadd.f32 %v108_v47, %v86_v46 }
 0x1cd   :  { %113 = vst.msk [vmem:[#allocation3 + $0x8] sm:$0xff] %vm43_vm0, %v110_v48 }
 0x1ce   :  { %v130_v60 = vpop.xlane.xlu0 %129 }
 0x1d0   :  { %v133_v49 = vld [vmem:[#allocation3] sm:$0xff] }
 0x1d1   :  { %168 = vlog2.f32 %v133_v49 }
 0x1d4   :  { %v134_v50 = vld [vmem:[#allocation3 + $0x8] sm:$0xff] }
 0x1d5   :  { %170 = vlog2.f32 %v134_v50 }
 0x1de   :  { %v169_v51 = vpop.eup %168 }
 0x1df   :  { %v136_v53 = vmul.f32 0.6931472, %v169_v51 }
 0x1e1   :  { %v139_v55 = vadd.f32 %v136_v53, %v131_v54 }
 0x1e2   :  { %v171_v56 = vpop.eup %170 }
 0x1e3   :  { %v141_v57 = vsub.f32 %v139_v55, %v127_v52  ;;  %v138_v58 = vmul.f32 0.6931472, %v171_v56 }
 0x1e5   :  { %143 = vst.msk [vmem:[%s272_s2] sm:$0xff] %vm43_vm0, %v141_v57  ;;  %v140_v61 = vadd.f32 %v138_v58, %v132_v59 }
 0x1e7   :  { %v142_v62 = vsub.f32 %v140_v61, %v130_v60 }
 0x1e9   :  { %144 = vst.msk [vmem:[%s272_s2 + $0x8] sm:$0xff] %vm43_vm0, %v142_v62 }
 0x1ea   :  { %149 = vsyncpa [#allocation5], 1 }
 0x1eb   :  { %150 = vsyncpa [#allocation7], 1 }

</bundles_post_ra>
